<compile_context>
chip_gen: v6e
topology: v6e:2x2x1
jax: 0.10.0
libtpu: 0.0.40
codegen_flags: <defaults>
</compile_context>

<pallas_src>
import functools

import jax
import jax.numpy as jnp
from jax.experimental import pallas as pl
from jax.experimental.pallas import tpu as pltpu


def _make_charcnn_kernel(L_out, F):
    def kernel(x_ref, w_ref, b_ref, o_ref):
        # x_ref: (TB, L*D)       bf16 -- flattened char embeddings (lane-dense)
        # w_ref: (L*D, L_out*F)  bf16 -- banded conv weight, col index = t*F + f
        # b_ref: (1, F)          f32  -- conv bias
        # o_ref: (TB, F)         f32  -- max-pooled filter activations
        y = jnp.dot(x_ref[...], w_ref[...], preferred_element_type=jnp.float32)

        # Max over time t (columns are ordered t*F + f): halving tree on lane
        # slices while the remaining time extent is even, then a short linear
        # tail.  Stays entirely on the lane axis -> no sublane relayout.
        n = L_out
        while n > 1 and n % 2 == 0:
            half = n // 2
            y = jnp.maximum(y[:, : half * F], y[:, half * F : n * F])
            n = half
        m = y[:, :F]
        for t in range(1, n):
            m = jnp.maximum(m, y[:, t * F : (t + 1) * F])

        # Bias after the pool (equivalent to conv+bias -> max).
        o_ref[...] = m + b_ref[...]

    return kernel


@functools.partial(jax.jit, static_argnames=("padding", "tile_b"))
def char_cnn_forward(x, weight, bias, padding=(1, 0), tile_b=128):
    """x: (B, 1, L, D) float32 (NCHW); weight: (F, 1, KH, D); bias: (F,).
    Returns (B, F), identical to the PyTorch CharCNN forward."""
    B, C, L, D = x.shape
    assert C == 1
    F, _, KH, KW = weight.shape
    assert KW == D, "conv kernel width must equal char embedding size"
    P = int(padding[0])
    L_out = L + 2 * P - KH + 1

    # Words per grid step: multiple of 8 (sublane-aligned output block);
    # 128 keeps per-tile VMEM (x block + f32 matmul result) well under the
    # default scoped VMEM limit and leaves >=2 grid steps for megacore.
    TB = min(tile_b, B)
    if TB < B:
        TB = max(8, (TB // 8) * 8)

    # Lane-dense bf16 input slab for the MXU: (B, L*D).
    x2 = x[:, 0, :, :].reshape(B, L * D).astype(jnp.bfloat16)

    # Banded "Toeplitz" conv weight:
    #   W_big[l*D + d, t*F + f] = w[f, 0, l - t + P, d]  if 0 <= l-t+P < KH else 0
    # so x_flat @ W_big reproduces Conv2d(1, F, (KH, D), padding=(P, 0)).
    w_t = jnp.transpose(weight[:, 0, :, :], (1, 2, 0))            # (KH, D, F)
    l_idx = jnp.arange(L)[:, None]                                # (L, 1)
    t_idx = jnp.arange(L_out)[None, :]                            # (1, L_out)
    kh = l_idx - t_idx + P                                        # (L, L_out)
    valid = ((kh >= 0) & (kh < KH)).astype(w_t.dtype)
    big = w_t[jnp.clip(kh, 0, KH - 1)]                            # (L, L_out, D, F)
    big = big * valid[:, :, None, None]
    big = jnp.transpose(big, (0, 2, 1, 3)).reshape(L * D, L_out * F)
    w2 = big.astype(jnp.bfloat16)                                 # (L*D, L_out*F)

    b2 = bias.reshape(1, F).astype(jnp.float32)

    kernel = _make_charcnn_kernel(L_out, F)

    return pl.pallas_call(
        kernel,
        out_shape=jax.ShapeDtypeStruct((B, F), jnp.float32),
        grid_spec=pl.GridSpec(
            grid=(pl.cdiv(B, TB),),
            in_specs=[
                pl.BlockSpec((TB, L * D), lambda t: (t, 0)),
                pl.BlockSpec((L * D, L_out * F), lambda t: (0, 0)),
                pl.BlockSpec((1, F), lambda t: (0, 0)),
            ],
            out_specs=pl.BlockSpec((TB, F), lambda t: (t, 0)),
        ),
        compiler_params=pltpu.CompilerParams(
            dimension_semantics=("parallel",)),
    )(x2, w2, b2)


def char_cnn_reference(x, weight, bias, padding):
    """Plain-JAX f32 reference matching torch: conv2d -> squeeze(-1) -> max_pool1d."""
    P = padding[0]
    y = jax.lax.conv_general_dilated(
        x, weight, window_strides=(1, 1),
        padding=((P, P), (0, 0)),
        dimension_numbers=("NCHW", "OIHW", "NCHW"))               # (B, F, L_out, 1)
    y = y + bias[None, :, None, None]
    y = y[..., 0]                                                 # (B, F, L_out)
    return jnp.max(y, axis=2)                                     # (B, F)


if __name__ == "__main__":
    # Module hyper-params (kernel_sizes=(KH, D), padding=(1, 0) so the conv
    # collapses the embedding axis, as the torch forward's squeeze(-1) needs).
    num_filters = 32
    KH = 3
    D = 16               # char_embed_size
    L = 16               # max_word_len
    padding = (1, 0)
    batch, seq_len = 8, 32
    B = batch * seq_len  # 256 words -> 2 parallel tiles of TB=128

    key = jax.random.PRNGKey(0)
    kx, kw, kb = jax.random.split(key, 3)

    # deterministic parameter init (PyTorch-style uniform bound 1/sqrt(fan_in))
    fan_in = 1 * KH * D
    bound = 1.0 / (fan_in ** 0.5)
    weight = jax.random.uniform(kw, (num_filters, 1, KH, D),
                                minval=-bound, maxval=bound, dtype=jnp.float32)
    bias = jax.random.uniform(kb, (num_filters,),
                              minval=-bound, maxval=bound, dtype=jnp.float32)
    x = jax.random.normal(kx, (B, 1, L, D), dtype=jnp.float32)

    out = char_cnn_forward(x, weight, bias, padding=padding, tile_b=128)
    out = jax.block_until_ready(out)

    ref = char_cnn_reference(x, weight, bias, padding)
    assert out.shape == (B, num_filters)
    # bf16 MXU operands with f32 accumulation: loosened tolerance vs f32 ref.
    err = float(jnp.max(jnp.abs(out - ref)))
    assert jnp.allclose(out, ref, atol=5e-2, rtol=5e-2), (
        "mismatch vs reference: max abs err = %f" % err)

    print("KERNEL_OK")
</pallas_src>

<mosaic_0001>
module attributes {stable_mosaic.version = 11 : i64} {
  func.func @kernel(%arg0: i32, %arg1: memref<128x256xbf16, #tpu.memory_space<vmem>>, %arg2: memref<256x512xbf16, #tpu.memory_space<vmem>>, %arg3: memref<1x32xf32, #tpu.memory_space<vmem>>, %arg4: memref<128x32xf32, #tpu.memory_space<vmem>>) attributes {dimension_semantics = [#tpu.dimension_semantics<parallel>], iteration_bounds = array<i64: 2>, scalar_prefetch = 0 : i64, scratch_operands = 0 : i64, tpu.core_type = #tpu.core_type<tc>, window_params = [{transform_indices = @transform_0, window_bounds = array<i64: 128, 256>}, {pipeline_mode = #tpu.pipeline_mode<synchronous>, transform_indices = @transform_1, window_bounds = array<i64: 256, 512>}, {pipeline_mode = #tpu.pipeline_mode<synchronous>, transform_indices = @transform_2, window_bounds = array<i64: 1, 32>}, {transform_indices = @transform_3, window_bounds = array<i64: 128, 32>}]} {
    %c0 = arith.constant 0 : index
    %c0_0 = arith.constant 0 : index
    %0 = vector.load %arg1[%c0, %c0_0] : memref<128x256xbf16, #tpu.memory_space<vmem>>, vector<128x256xbf16>
    %c0_1 = arith.constant 0 : index
    %c0_2 = arith.constant 0 : index
    %1 = vector.load %arg2[%c0_1, %c0_2] : memref<256x512xbf16, #tpu.memory_space<vmem>>, vector<256x512xbf16>
    %cst = arith.constant dense<0.000000e+00> : vector<128x512xf32>
    %2 = tpu.matmul %0, %1, %cst {dimension_numbers = #tpu.dot_dimension_numbers<[1], [0], [0], [1], [0, 0, 1, 1], [], []>} : vector<128x256xbf16>, vector<256x512xbf16>, vector<128x512xf32> -> vector<128x512xf32>
    %3 = vector.extract_strided_slice %2 {offsets = [0, 0], sizes = [128, 256], strides = [1, 1]} : vector<128x512xf32> to vector<128x256xf32>
    %4 = vector.extract_strided_slice %2 {offsets = [0, 256], sizes = [128, 256], strides = [1, 1]} : vector<128x512xf32> to vector<128x256xf32>
    %5 = arith.maximumf %3, %4 : vector<128x256xf32>
    %6 = vector.extract_strided_slice %5 {offsets = [0, 0], sizes = [128, 128], strides = [1, 1]} : vector<128x256xf32> to vector<128x128xf32>
    %7 = vector.extract_strided_slice %5 {offsets = [0, 128], sizes = [128, 128], strides = [1, 1]} : vector<128x256xf32> to vector<128x128xf32>
    %8 = arith.maximumf %6, %7 : vector<128x128xf32>
    %9 = vector.extract_strided_slice %8 {offsets = [0, 0], sizes = [128, 64], strides = [1, 1]} : vector<128x128xf32> to vector<128x64xf32>
    %10 = vector.extract_strided_slice %8 {offsets = [0, 64], sizes = [128, 64], strides = [1, 1]} : vector<128x128xf32> to vector<128x64xf32>
    %11 = arith.maximumf %9, %10 : vector<128x64xf32>
    %12 = vector.extract_strided_slice %11 {offsets = [0, 0], sizes = [128, 32], strides = [1, 1]} : vector<128x64xf32> to vector<128x32xf32>
    %13 = vector.extract_strided_slice %11 {offsets = [0, 32], sizes = [128, 32], strides = [1, 1]} : vector<128x64xf32> to vector<128x32xf32>
    %14 = arith.maximumf %12, %13 : vector<128x32xf32>
    %c0_3 = arith.constant 0 : index
    %c0_4 = arith.constant 0 : index
    %15 = vector.load %arg3[%c0_3, %c0_4] : memref<1x32xf32, #tpu.memory_space<vmem>>, vector<1x32xf32>
    %16 = vector.broadcast %15 : vector<1x32xf32> to vector<128x32xf32>
    %17 = arith.addf %14, %16 : vector<128x32xf32>
    %c0_5 = arith.constant 0 : index
    %c0_6 = arith.constant 0 : index
    %18 = vector.load %arg4[%c0_5, %c0_6] : memref<128x32xf32, #tpu.memory_space<vmem>>, vector<128x32xf32>
    tpu.vector_store %arg4[%c0_5, %c0_6], %17 {strides = array<i32>} : memref<128x32xf32, #tpu.memory_space<vmem>>, vector<128x32xf32>,
    return
  }
  func.func @transform_0(%arg0: i32) -> (i32, i32) {
    %c0_i32 = arith.constant 0 : i32
    %c0_i32_0 = arith.constant 0 : i32
    return %arg0, %c0_i32 : i32, i32
  }
  func.func @transform_1(%arg0: i32) -> (i32, i32) {
    %c0_i32 = arith.constant 0 : i32
    %c0_i32_0 = arith.constant 0 : i32
    %c0_i32_1 = arith.constant 0 : i32
    return %c0_i32, %c0_i32_0 : i32, i32
  }
  func.func @transform_2(%arg0: i32) -> (i32, i32) {
    %c0_i32 = arith.constant 0 : i32
    %c0_i32_0 = arith.constant 0 : i32
    %c0_i32_1 = arith.constant 0 : i32
    return %c0_i32, %c0_i32_0 : i32, i32
  }
  func.func @transform_3(%arg0: i32) -> (i32, i32) {
    %c0_i32 = arith.constant 0 : i32
    %c0_i32_0 = arith.constant 0 : i32
    return %arg0, %c0_i32 : i32, i32
  }
}

</mosaic_0001>

<bundles_post_ra>
// kernel: char_cnn_forward.1
= control target key start
LH: loop header
LB: loop body
LE: loop exit
PB: predicated region body
PF: predicated region fallthrough
CT: control target
= control target key end

     0   :  { %s1441_s12 = smov 0   ;;  %s1836_s0 = inlined_call_operand.vmem [shape: bf16[256,256], index: 0, kind: input, shape index: {}]   ;;  %s1837_s1 = inlined_call_operand.vmem [shape: bf16[256,512], index: 1, kind: input, shape index: {}]   ;;  %s1838_s2 = inlined_call_operand.vmem [shape: f32[1,32], index: 2, kind: input, shape index: {}]   ;;  %s1839_s3 = inlined_call_operand.vmem [shape: f32[256,32], index: 3, kind: output, shape index: {}]  }
   0x1 LB: > { %s1187_s13 = sadd.s32 4294967295, %s1417_s12   ;;  %p1191_p0 = scmp.ge.s32.totalorder %s1417_s12, 1  ;;  %s1417_s12 = sphi %s1441_s12, %s13_s12  }
   0x2   : > { %p139_p1 = scmp.lt.s32.totalorder %s1417_s12, 3 }
   0x4   : > { %p140_p2 = pnand %p1191_p0, %p139_p1 }
   0x5   : > { %s1192_s24 = sshll.u32 (!%p140_p2), %s1187_s13, 4  ;;  %s1419_s25 = smov (!%p140_p2), 64  }
   0x6   : > { %143 = sbr.rel (%p140_p2) target bundleno = 572 (0x23c), region = 32  ;;  %p165_p3 = scmp.lt.s32.totalorder (!%p140_p2), %s1192_s24, 31 }
   0xb   : > { %v1291_v0 = vld [vmem:[%s1837_s1 + $0xe4] ss:$16 sps:$4 sm:$0xff]   ;;  %v1293_v1 = vld [vmem:[%s1837_s1 + $0xec] ss:$16 sps:$4 sm:$0xff]   ;;  %v1295_v2 = vld [vmem:[%s1837_s1 + $0xe0] ss:$16 sps:$4 sm:$0xff]  }
   0xc   : > { %657 = vmatprep.subr.bf16.mxu0 %v1291_v0  ;;  %v1296_v3 = vld [vmem:[%s1837_s1 + $0xe8] ss:$16 sps:$4 sm:$0xff]   ;;  %770 = vmatprep.subr.bf16.mxu1 %v1293_v1  ;;  %v1297_v4 = vld [vmem:[%s1837_s1 + $0xc4] ss:$16 sps:$4 sm:$0xff]   ;;  %v1299_v5 = vld [vmem:[%s1837_s1 + $0xcc] ss:$16 sps:$4 sm:$0xff]  }
   0xd   : > { %658 = vmatpush1.bf16.msra.mxu0 %v1295_v2  ;;  %771 = vmatpush1.bf16.msra.mxu1 %v1296_v3  ;;  %v1301_v6 = vld [vmem:[%s1837_s1 + $0xc0] ss:$16 sps:$4 sm:$0xff]   ;;  %v1302_v7 = vld [vmem:[%s1837_s1 + $0xc8] ss:$16 sps:$4 sm:$0xff]   ;;  %v1303_v8 = vld [vmem:[%s1837_s1 + $0xa4] ss:$16 sps:$4 sm:$0xff]  }
   0xe   : > { %659 = vmatprep.subr.bf16.mxu0 %v1297_v4  ;;  %772 = vmatprep.subr.bf16.mxu1 %v1299_v5  ;;  %v1305_v9 = vld [vmem:[%s1837_s1 + $0xac] ss:$16 sps:$4 sm:$0xff]   ;;  %v1307_v10 = vld [vmem:[%s1837_s1 + $0xa0] ss:$16 sps:$4 sm:$0xff]   ;;  %v1308_v11 = vld [vmem:[%s1837_s1 + $0xa8] ss:$16 sps:$4 sm:$0xff]  }
   0xf   : > { %v1309_v12 = vld [vmem:[%s1837_s1 + $0x84] ss:$16 sps:$4 sm:$0xff]   ;;  %v1311_v13 = vld [vmem:[%s1837_s1 + $0x8c] ss:$16 sps:$4 sm:$0xff]   ;;  %v1313_v14 = vld [vmem:[%s1837_s1 + $0x80] ss:$16 sps:$4 sm:$0xff]  }
  0x10   : > { %v1314_v15 = vld [vmem:[%s1837_s1 + $0x88] ss:$16 sps:$4 sm:$0xff]   ;;  %v1315_v16 = vld [vmem:[%s1837_s1 + $0x64] ss:$16 sps:$4 sm:$0xff]   ;;  %v1317_v17 = vld [vmem:[%s1837_s1 + $0x6c] ss:$16 sps:$4 sm:$0xff]  }
  0x11   : > { %660 = vmatpush1.bf16.msra.mxu0 %v1301_v6  ;;  %773 = vmatpush1.bf16.msra.mxu1 %v1302_v7  ;;  %v1319_v18 = vld [vmem:[%s1837_s1 + $0x60] ss:$16 sps:$4 sm:$0xff]   ;;  %v1320_v19 = vld [vmem:[%s1837_s1 + $0x68] ss:$16 sps:$4 sm:$0xff]   ;;  %v1321_v20 = vld [vmem:[%s1837_s1 + $0x44] ss:$16 sps:$4 sm:$0xff]  }
  0x12   : > { %661 = vmatprep.subr.bf16.mxu0 %v1303_v8  ;;  %774 = vmatprep.subr.bf16.mxu1 %v1305_v9  ;;  %v1323_v21 = vld [vmem:[%s1837_s1 + $0x4c] ss:$16 sps:$4 sm:$0xff]   ;;  %v1325_v22 = vld [vmem:[%s1837_s1 + $0x40] ss:$16 sps:$4 sm:$0xff]   ;;  %v1326_v23 = vld [vmem:[%s1837_s1 + $0x48] ss:$16 sps:$4 sm:$0xff]  }
  0x13   : > { %v1327_v24 = vld [vmem:[%s1837_s1 + $0x24] ss:$16 sps:$4 sm:$0xff]   ;;  %v1329_v25 = vld [vmem:[%s1837_s1 + $0x2c] ss:$16 sps:$4 sm:$0xff]   ;;  %v1331_v26 = vld [vmem:[%s1837_s1 + $0x20] ss:$16 sps:$4 sm:$0xff]  }
  0x14   : > { %v1332_v27 = vld [vmem:[%s1837_s1 + $0x28] ss:$16 sps:$4 sm:$0xff]   ;;  %v1333_v28 = vld [vmem:[%s1837_s1 + $0x4] ss:$16 sps:$4 sm:$0xff]   ;;  %v1335_v29 = vld [vmem:[%s1837_s1 + $0xc] ss:$16 sps:$4 sm:$0xff]  }
  0x15   : > { %662 = vmatpush1.bf16.msra.mxu0 %v1307_v10  ;;  %775 = vmatpush1.bf16.msra.mxu1 %v1308_v11  ;;  %v1337_v30 = vld [vmem:[%s1837_s1] ss:$16 sps:$4 sm:$0xff]   ;;  %v1338_v31 = vld [vmem:[%s1837_s1 + $0x8] ss:$16 sps:$4 sm:$0xff]   ;;  %v1339_v32 = vld [vmem:[%s1837_s1 + $0x1e4] ss:$16 sps:$4 sm:$0xff]  }
  0x16   : > { %663 = vmatprep.subr.bf16.mxu0 %v1309_v12  ;;  %776 = vmatprep.subr.bf16.mxu1 %v1311_v13  ;;  %v1341_v33 = vld [vmem:[%s1837_s1 + $0x1ec] ss:$16 sps:$4 sm:$0xff]   ;;  %v1343_v34 = vld [vmem:[%s1837_s1 + $0x1e0] ss:$16 sps:$4 sm:$0xff]   ;;  %v1344_v35 = vld [vmem:[%s1837_s1 + $0x1e8] ss:$16 sps:$4 sm:$0xff]  }
  0x17   : > { %v1345_v36 = vld [vmem:[%s1837_s1 + $0x1c4] ss:$16 sps:$4 sm:$0xff]   ;;  %v1347_v37 = vld [vmem:[%s1837_s1 + $0x1cc] ss:$16 sps:$4 sm:$0xff]   ;;  %s1841_s24 = smov (!%p165_p3, %s1192_s24), 31  ;;  %vm1114_vm0 = vcmask 261120  }
  0x18   : > { %v1349_v38 = vld [vmem:[%s1837_s1 + $0x1c0] ss:$16 sps:$4 sm:$0xff]   ;;  %v1350_v39 = vld [vmem:[%s1837_s1 + $0x1c8] ss:$16 sps:$4 sm:$0xff]   ;;  %v1351_v40 = vld [vmem:[%s1837_s1 + $0x1a4] ss:$16 sps:$4 sm:$0xff]  }
  0x19   : > { %664 = vmatpush1.bf16.msra.mxu0 %v1313_v14  ;;  %777 = vmatpush1.bf16.msra.mxu1 %v1314_v15  ;;  %v1353_v41 = vld [vmem:[%s1837_s1 + $0x1ac] ss:$16 sps:$4 sm:$0xff]   ;;  %s1280_s23 = sshll.u32 %s1841_s24, 3  ;;  %v1355_v42 = vld [vmem:[%s1837_s1 + $0x1a0] ss:$16 sps:$4 sm:$0xff]  }
  0x1a   : > { %665 = vmatprep.subr.bf16.mxu0 %v1315_v16  ;;  %778 = vmatprep.subr.bf16.mxu1 %v1317_v17  ;;  %v1356_v43 = vld [vmem:[%s1837_s1 + $0x1a8] ss:$16 sps:$4 sm:$0xff]   ;;  %v1357_v44 = vld [vmem:[%s1837_s1 + $0x184] ss:$16 sps:$4 sm:$0xff]   ;;  %s1594_s13 = scalar_lea.vmem %s1836_s0, %s1280_s23  ;;  %v1359_v45 = vld [vmem:[%s1837_s1 + $0x18c] ss:$16 sps:$4 sm:$0xff]   ;;  %s1777_s30 = scalar_lea.vmem %s1839_s3, %s1280_s23 }
  0x1b   : > { %v1361_v46 = vld [vmem:[%s1837_s1 + $0x180] ss:$16 sps:$4 sm:$0xff]   ;;  %v1362_v47 = vld [vmem:[%s1837_s1 + $0x188] ss:$16 sps:$4 sm:$0xff]   ;;  %v1389_v48 = vld [vmem:[%s1594_s13 + $0x4] ss:$8 sps:$4 sm:$0xff]  }
  0x1c   : > { %v1363_v49 = vld [vmem:[%s1837_s1 + $0x164] ss:$16 sps:$4 sm:$0xff]   ;;  %v1365_v50 = vld [vmem:[%s1837_s1 + $0x16c] ss:$16 sps:$4 sm:$0xff]   ;;  %689 = vmatprep.mubr.bf16.mxu0 %v1389_v48  ;;  %802 = vmatprep.mubr.bf16.mxu1 %v1389_v48  ;;  %v1367_v51 = vld [vmem:[%s1837_s1 + $0x160] ss:$16 sps:$4 sm:$0xff]  }
  0x1d   : > { %666 = vmatpush1.bf16.msra.mxu0 %v1319_v18  ;;  %779 = vmatpush1.bf16.msra.mxu1 %v1320_v19  ;;  %v1368_v52 = vld [vmem:[%s1837_s1 + $0x168] ss:$16 sps:$4 sm:$0xff]   ;;  %v1369_v53 = vld [vmem:[%s1837_s1 + $0x144] ss:$16 sps:$4 sm:$0xff]   ;;  %v1371_v54 = vld [vmem:[%s1837_s1 + $0x14c] ss:$16 sps:$4 sm:$0xff]  }
  0x1e   : > { %667 = vmatprep.subr.bf16.mxu0 %v1321_v20  ;;  %780 = vmatprep.subr.bf16.mxu1 %v1323_v21  ;;  %v1373_v55 = vld [vmem:[%s1837_s1 + $0x140] ss:$16 sps:$4 sm:$0xff]   ;;  %v1374_v56 = vld [vmem:[%s1837_s1 + $0x148] ss:$16 sps:$4 sm:$0xff]   ;;  %v1375_v57 = vld [vmem:[%s1837_s1 + $0x124] ss:$16 sps:$4 sm:$0xff]  }
  0x1f   : > { %v1377_v58 = vld [vmem:[%s1837_s1 + $0x12c] ss:$16 sps:$4 sm:$0xff]   ;;  %v1379_v59 = vld [vmem:[%s1837_s1 + $0x120] ss:$16 sps:$4 sm:$0xff]   ;;  %v1380_v60 = vld [vmem:[%s1837_s1 + $0x128] ss:$16 sps:$4 sm:$0xff]  }
  0x20   : > { %v1381_v61 = vld [vmem:[%s1837_s1 + $0x104] ss:$16 sps:$4 sm:$0xff]   ;;  %v1383_v62 = vld [vmem:[%s1837_s1 + $0x10c] ss:$16 sps:$4 sm:$0xff]   ;;  %v1385_v63 = vld [vmem:[%s1837_s1 + $0x100] ss:$16 sps:$4 sm:$0xff]  }
  0x21   : > { %668 = vmatpush1.bf16.msra.mxu0 %v1325_v22  ;;  %781 = vmatpush1.bf16.msra.mxu1 %v1326_v23  ;;  %v1386_v0 = vld [vmem:[%s1837_s1 + $0x108] ss:$16 sps:$4 sm:$0xff]   ;;  %v1390_v2 = vld [vmem:[%s1594_s13 + $0x14] ss:$8 sps:$4 sm:$0xff]   ;;  %v1393_v4 = vld [vmem:[%s1594_s13 + $0x24] ss:$8 sps:$4 sm:$0xff]  }
  0x22   : > { %669 = vmatprep.subr.bf16.mxu0 %v1327_v24  ;;  %782 = vmatprep.subr.bf16.mxu1 %v1329_v25  ;;  %v1387_v1 = vld [vmem:[%s1594_s13] ss:$8 sps:$4 sm:$0xff]   ;;  %v1392_v3 = vld [vmem:[%s1594_s13 + $0x10] ss:$8 sps:$4 sm:$0xff]   ;;  %v1396_v6 = vld [vmem:[%s1594_s13 + $0x34] ss:$8 sps:$4 sm:$0xff]  }
  0x23   : > { %v1395_v5 = vld [vmem:[%s1594_s13 + $0x20] ss:$8 sps:$4 sm:$0xff]   ;;  %v1398_v7 = vld [vmem:[%s1594_s13 + $0x30] ss:$8 sps:$4 sm:$0xff]   ;;  %v1399_v8 = vld [vmem:[%s1594_s13 + $0x44] ss:$8 sps:$4 sm:$0xff]  }
  0x24   : > { %v1401_v9 = vld [vmem:[%s1594_s13 + $0x40] ss:$8 sps:$4 sm:$0xff]   ;;  %v1402_v10 = vld [vmem:[%s1594_s13 + $0x54] ss:$8 sps:$4 sm:$0xff]   ;;  %v1404_v11 = vld [vmem:[%s1594_s13 + $0x50] ss:$8 sps:$4 sm:$0xff]  }
  0x25   : > { %670 = vmatpush1.bf16.msra.mxu0 %v1331_v26  ;;  %783 = vmatpush1.bf16.msra.mxu1 %v1332_v27  ;;  %v1405_v12 = vld [vmem:[%s1594_s13 + $0x64] ss:$8 sps:$4 sm:$0xff]   ;;  %v1407_v13 = vld [vmem:[%s1594_s13 + $0x60] ss:$8 sps:$4 sm:$0xff]   ;;  %v1408_v14 = vld [vmem:[%s1594_s13 + $0x74] ss:$8 sps:$4 sm:$0xff]  }
  0x26   : > { %671 = vmatprep.subr.bf16.mxu0 %v1333_v28  ;;  %784 = vmatprep.subr.bf16.mxu1 %v1335_v29  ;;  %v1410_v15 = vld [vmem:[%s1594_s13 + $0x70] ss:$8 sps:$4 sm:$0xff]   ;;  %s1420_s13 = smov 96  }
  0x29   : > { %672 = vmatpush1.bf16.msra.mxu0 %v1337_v30  ;;  %785 = vmatpush1.bf16.msra.mxu1 %v1338_v31 }
  0x2a   : > { %673 = vmatprep.subr.bf16.mxu0 %v1339_v32  ;;  %786 = vmatprep.subr.bf16.mxu1 %v1341_v33 }
  0x2d   : > { %674 = vmatpush2.bf16.msra.mxu0 %v1343_v34  ;;  %787 = vmatpush2.bf16.msra.mxu1 %v1344_v35 }
  0x2e   : > { %675 = vmatprep.subr.bf16.mxu0 %v1345_v36  ;;  %788 = vmatprep.subr.bf16.mxu1 %v1347_v37 }
  0x31   : > { %676 = vmatpush2.bf16.msra.mxu0 %v1349_v38  ;;  %789 = vmatpush2.bf16.msra.mxu1 %v1350_v39 }
  0x32   : > { %677 = vmatprep.subr.bf16.mxu0 %v1351_v40  ;;  %790 = vmatprep.subr.bf16.mxu1 %v1353_v41 }
  0x35   : > { %678 = vmatpush2.bf16.msra.mxu0 %v1355_v42  ;;  %791 = vmatpush2.bf16.msra.mxu1 %v1356_v43 }
  0x36   : > { %679 = vmatprep.subr.bf16.mxu0 %v1357_v44  ;;  %792 = vmatprep.subr.bf16.mxu1 %v1359_v45 }
  0x39   : > { %680 = vmatpush2.bf16.msra.mxu0 %v1361_v46  ;;  %793 = vmatpush2.bf16.msra.mxu1 %v1362_v47 }
  0x3a   : > { %681 = vmatprep.subr.bf16.mxu0 %v1363_v49  ;;  %794 = vmatprep.subr.bf16.mxu1 %v1365_v50 }
  0x3d   : > { %682 = vmatpush2.bf16.msra.mxu0 %v1367_v51  ;;  %795 = vmatpush2.bf16.msra.mxu1 %v1368_v52 }
  0x3e   : > { %683 = vmatprep.subr.bf16.mxu0 %v1369_v53  ;;  %796 = vmatprep.subr.bf16.mxu1 %v1371_v54 }
  0x41   : > { %684 = vmatpush2.bf16.msra.mxu0 %v1373_v55  ;;  %797 = vmatpush2.bf16.msra.mxu1 %v1374_v56 }
  0x42   : > { %685 = vmatprep.subr.bf16.mxu0 %v1375_v57  ;;  %798 = vmatprep.subr.bf16.mxu1 %v1377_v58 }
  0x45   : > { %686 = vmatpush2.bf16.msra.mxu0 %v1379_v59  ;;  %799 = vmatpush2.bf16.msra.mxu1 %v1380_v60 }
  0x46   : > { %687 = vmatprep.subr.bf16.mxu0 %v1381_v61  ;;  %800 = vmatprep.subr.bf16.mxu1 %v1383_v62 }
  0x49   : > { %688 = vmatpush2.bf16.msra.mxu0 %v1385_v63  ;;  %801 = vmatpush2.bf16.msra.mxu1 %v1386_v0 }
  0x4c   : > { %690 = vmatmul.mubr.bf16.vlgmr.msra.gmra.mxu0 %v1387_v1  ;;  %803 = vmatmul.mubr.bf16.vlgmr.msra.gmra.mxu1 %v1387_v1 }
  0x4d   : > { %699 = vmatprep.mubr.bf16.mxu0 %v1390_v2  ;;  %812 = vmatprep.mubr.bf16.mxu1 %v1390_v2 }
  0x54   : > { %700 = vmatmul.mubr.bf16.gmra.mxu0 %v1392_v3  ;;  %813 = vmatmul.mubr.bf16.gmra.mxu1 %v1392_v3 }
  0x55   : > { %709 = vmatprep.mubr.bf16.mxu0 %v1393_v4  ;;  %822 = vmatprep.mubr.bf16.mxu1 %v1393_v4 }
  0x5c   : > { %710 = vmatmul.mubr.bf16.gmra.mxu0 %v1395_v5  ;;  %823 = vmatmul.mubr.bf16.gmra.mxu1 %v1395_v5 }
  0x5d   : > { %719 = vmatprep.mubr.bf16.mxu0 %v1396_v6  ;;  %832 = vmatprep.mubr.bf16.mxu1 %v1396_v6 }
  0x64   : > { %720 = vmatmul.mubr.bf16.gmra.mxu0 %v1398_v7  ;;  %833 = vmatmul.mubr.bf16.gmra.mxu1 %v1398_v7 }
  0x65   : > { %729 = vmatprep.mubr.bf16.mxu0 %v1399_v8  ;;  %842 = vmatprep.mubr.bf16.mxu1 %v1399_v8 }
  0x6c   : > { %730 = vmatmul.mubr.bf16.gmra.mxu0 %v1401_v9  ;;  %843 = vmatmul.mubr.bf16.gmra.mxu1 %v1401_v9 }
  0x6d   : > { %739 = vmatprep.mubr.bf16.mxu0 %v1402_v10  ;;  %852 = vmatprep.mubr.bf16.mxu1 %v1402_v10 }
  0x74   : > { %740 = vmatmul.mubr.bf16.gmra.mxu0 %v1404_v11  ;;  %853 = vmatmul.mubr.bf16.gmra.mxu1 %v1404_v11 }
  0x75   : > { %749 = vmatprep.mubr.bf16.mxu0 %v1405_v12  ;;  %862 = vmatprep.mubr.bf16.mxu1 %v1405_v12 }
  0x7c   : > { %750 = vmatmul.mubr.bf16.gmra.mxu0 %v1407_v13  ;;  %863 = vmatmul.mubr.bf16.gmra.mxu1 %v1407_v13 }
  0x7d   : > { %759 = vmatprep.mubr.bf16.mxu0 %v1408_v14  ;;  %872 = vmatprep.mubr.bf16.mxu1 %v1408_v14 }
  0x84   : > { %760 = vmatmul.mubr.bf16.gmra.mxu0 %v1410_v15  ;;  %873 = vmatmul.mubr.bf16.gmra.mxu1 %v1410_v15 }
 0x10c   : > { %v691_v16 = vpop.f32.mrf.mxu0  ;;  %v804_v17 = vpop.f32.mrf.mxu1 }
 0x10d   : > { %v883_v20 = vmax.f32 %v691_v16, %v804_v17 }
 0x10e   : > { %v693_v18 = vpop.f32.mrf.mxu0  ;;  %v806_v19 = vpop.f32.mrf.mxu1 }
 0x10f   : > { %v884_v21 = vmax.f32 %v693_v18, %v806_v19 }
 0x110   : > { %v695_v22 = vpop.f32.mrf.mxu0  ;;  %v808_v23 = vpop.f32.mrf.mxu1 }
 0x111   : > { %v1669_v24 = vmax.f32 %v883_v20, %v884_v21  ;;  %v885_v27 = vmax.f32 %v695_v22, %v808_v23 }
 0x112   : > { %v697_v25 = vpop.f32.mrf.mxu0  ;;  %v810_v26 = vpop.f32.mrf.mxu1 }
 0x113   : > { %v886_v28 = vmax.f32 %v697_v25, %v810_v26  ;;  %947 = vrot.lane.b32.xlu0 %v1669_v24, %s1419_s25 }
 0x114   : > { %v701_v29 = vpop.f32.mrf.mxu0  ;;  %v814_v30 = vpop.f32.mrf.mxu1 }
 0x115   : > { %v1673_v31 = vmax.f32 %v885_v27, %v886_v28  ;;  %v887_v34 = vmax.f32 %v701_v29, %v814_v30 }
 0x116   : > { %v703_v32 = vpop.f32.mrf.mxu0  ;;  %v816_v33 = vpop.f32.mrf.mxu1 }
 0x117   : > { %v888_v35 = vmax.f32 %v703_v32, %v816_v33  ;;  %949 = vrot.lane.b32.xlu0 %v1673_v31, %s1419_s25 }
 0x118   : > { %v705_v36 = vpop.f32.mrf.mxu0  ;;  %v818_v37 = vpop.f32.mrf.mxu1 }
 0x119   : > { %v1677_v38 = vmax.f32 %v887_v34, %v888_v35  ;;  %v889_v41 = vmax.f32 %v705_v36, %v818_v37 }
 0x11a   : > { %v707_v39 = vpop.f32.mrf.mxu0  ;;  %v820_v40 = vpop.f32.mrf.mxu1 }
 0x11b   : > { %v890_v42 = vmax.f32 %v707_v39, %v820_v40  ;;  %951 = vrot.lane.b32.xlu1 %v1677_v38, %s1419_s25 }
 0x11c   : > { %v711_v43 = vpop.f32.mrf.mxu0  ;;  %v824_v44 = vpop.f32.mrf.mxu1 }
 0x11d   : > { %v1681_v45 = vmax.f32 %v889_v41, %v890_v42  ;;  %v891_v48 = vmax.f32 %v711_v43, %v824_v44 }
 0x11e   : > { %v713_v46 = vpop.f32.mrf.mxu0  ;;  %v826_v47 = vpop.f32.mrf.mxu1 }
 0x11f   : > { %v892_v49 = vmax.f32 %v713_v46, %v826_v47  ;;  %953 = vrot.lane.b32.xlu1 %v1681_v45, %s1419_s25 }
 0x120   : > { %v715_v50 = vpop.f32.mrf.mxu0  ;;  %v828_v51 = vpop.f32.mrf.mxu1 }
 0x121   : > { %v1685_v52 = vmax.f32 %v891_v48, %v892_v49  ;;  %v893_v55 = vmax.f32 %v715_v50, %v828_v51 }
 0x122   : > { %v717_v53 = vpop.f32.mrf.mxu0  ;;  %v830_v54 = vpop.f32.mrf.mxu1 }
 0x123   : > { %v894_v56 = vmax.f32 %v717_v53, %v830_v54  ;;  %955 = vrot.lane.b32.xlu0 %v1685_v52, %s1419_s25 }
 0x124   : > { %v721_v57 = vpop.f32.mrf.mxu0  ;;  %v834_v58 = vpop.f32.mrf.mxu1 }
 0x125   : > { %v1689_v59 = vmax.f32 %v893_v55, %v894_v56  ;;  %v895_v62 = vmax.f32 %v721_v57, %v834_v58 }
 0x126   : > { %v723_v60 = vpop.f32.mrf.mxu0  ;;  %v836_v61 = vpop.f32.mrf.mxu1 }
 0x127   : > { %v896_v63 = vmax.f32 %v723_v60, %v836_v61  ;;  %957 = vrot.lane.b32.xlu1 %v1689_v59, %s1419_s25 }
 0x128   : > { %v725_v0 = vpop.f32.mrf.mxu0  ;;  %v838_v1 = vpop.f32.mrf.mxu1 }
 0x129   : > { %v1693_v2 = vmax.f32 %v895_v62, %v896_v63  ;;  %v897_v5 = vmax.f32 %v725_v0, %v838_v1 }
 0x12a   : > { %v727_v3 = vpop.f32.mrf.mxu0  ;;  %v840_v4 = vpop.f32.mrf.mxu1 }
 0x12b   : > { %v898_v6 = vmax.f32 %v727_v3, %v840_v4  ;;  %959 = vrot.lane.b32.xlu0 %v1693_v2, %s1419_s25 }
 0x12c   : > { %v731_v7 = vpop.f32.mrf.mxu0  ;;  %v844_v8 = vpop.f32.mrf.mxu1 }
 0x12d   : > { %v1697_v9 = vmax.f32 %v897_v5, %v898_v6  ;;  %v899_v12 = vmax.f32 %v731_v7, %v844_v8 }
 0x12e   : > { %v733_v10 = vpop.f32.mrf.mxu0  ;;  %v846_v11 = vpop.f32.mrf.mxu1 }
 0x12f   : > { %v900_v13 = vmax.f32 %v733_v10, %v846_v11  ;;  %961 = vrot.lane.b32.xlu1 %v1697_v9, %s1419_s25 }
 0x130   : > { %v735_v14 = vpop.f32.mrf.mxu0  ;;  %v848_v15 = vpop.f32.mrf.mxu1 }
 0x131   : > { %v1701_v16 = vmax.f32 %v899_v12, %v900_v13  ;;  %v901_v19 = vmax.f32 %v735_v14, %v848_v15 }
 0x132   : > { %v737_v17 = vpop.f32.mrf.mxu0  ;;  %v850_v18 = vpop.f32.mrf.mxu1 }
 0x133   : > { %v902_v20 = vmax.f32 %v737_v17, %v850_v18  ;;  %963 = vrot.lane.b32.xlu0 %v1701_v16, %s1419_s25 }
 0x134   : > { %v741_v21 = vpop.f32.mrf.mxu0  ;;  %v854_v22 = vpop.f32.mrf.mxu1 }
 0x135   : > { %v1705_v23 = vmax.f32 %v901_v19, %v902_v20  ;;  %v903_v27 = vmax.f32 %v741_v21, %v854_v22 }
 0x136   : > { %v743_v25 = vpop.f32.mrf.mxu0  ;;  %v856_v26 = vpop.f32.mrf.mxu1 }
 0x137   : > { %v904_v28 = vmax.f32 %v743_v25, %v856_v26  ;;  %965 = vrot.lane.b32.xlu1 %v1705_v23, %s1419_s25 }
 0x138   : > { %v745_v29 = vpop.f32.mrf.mxu0  ;;  %v858_v30 = vpop.f32.mrf.mxu1 }
 0x139   : > { %v1709_v32 = vmax.f32 %v903_v27, %v904_v28  ;;  %v905_v35 = vmax.f32 %v745_v29, %v858_v30 }
 0x13a   : > { %v747_v33 = vpop.f32.mrf.mxu0  ;;  %v860_v34 = vpop.f32.mrf.mxu1 }
 0x13b   : > { %v906_v36 = vmax.f32 %v747_v33, %v860_v34  ;;  %967 = vrot.lane.b32.xlu0 %v1709_v32, %s1419_s25  ;;  %v1770_v34 = vld [vmem:[%s1838_s2] ss:$0 sm:$0xff] }
 0x13c   : > { %v751_v37 = vpop.f32.mrf.mxu0  ;;  %v864_v39 = vpop.f32.mrf.mxu1 }
 0x13d   : > { %v1713_v40 = vmax.f32 %v905_v35, %v906_v36  ;;  %v907_v43 = vmax.f32 %v751_v37, %v864_v39 }
 0x13e   : > { %v753_v41 = vpop.f32.mrf.mxu0  ;;  %v866_v42 = vpop.f32.mrf.mxu1 }
 0x13f   : > { %v908_v44 = vmax.f32 %v753_v41, %v866_v42  ;;  %969 = vrot.lane.b32.xlu1 %v1713_v40, %s1419_s25 }
 0x140   : > { %v755_v46 = vpop.f32.mrf.mxu0  ;;  %v868_v47 = vpop.f32.mrf.mxu1 }
 0x141   : > { %v927_v48 = vmax.f32 %v907_v43, %v908_v44  ;;  %v909_v51 = vmax.f32 %v755_v46, %v868_v47 }
 0x142   : > { %v757_v49 = vpop.f32.mrf.mxu0  ;;  %v870_v50 = vpop.f32.mrf.mxu1 }
 0x143   : > { %v910_v53 = vmax.f32 %v757_v49, %v870_v50  ;;  %971 = vrot.lane.b32.xlu0 %v927_v48, %s1419_s25 }
 0x144   : > { %v761_v54 = vpop.f32.mrf.mxu0  ;;  %v874_v55 = vpop.f32.mrf.mxu1 }
 0x145   : > { %v928_v56 = vmax.f32 %v909_v51, %v910_v53  ;;  %v911_v60 = vmax.f32 %v761_v54, %v874_v55 }
 0x146   : > { %v763_v57 = vpop.f32.mrf.mxu0  ;;  %v876_v58 = vpop.f32.mrf.mxu1 }
 0x147   : > { %v912_v61 = vmax.f32 %v763_v57, %v876_v58  ;;  %973 = vrot.lane.b32.xlu1 %v928_v56, %s1419_s25 }
 0x148   : > { %v765_v62 = vpop.f32.mrf.mxu0  ;;  %v878_v63 = vpop.f32.mrf.mxu1 }
 0x149   : > { %v929_v0 = vmax.f32 %v911_v60, %v912_v61  ;;  %v913_v4 = vmax.f32 %v765_v62, %v878_v63 }
 0x14a   : > { %v767_v1 = vpop.f32.mrf.mxu0  ;;  %v880_v3 = vpop.f32.mrf.mxu1 }
 0x14b   : > { %v914_v5 = vmax.f32 %v767_v1, %v880_v3  ;;  %975 = vrot.lane.b32.xlu0 %v929_v0, %s1419_s25 }
 0x14d   : > { %v930_v6 = vmax.f32 %v913_v4, %v914_v5 }
 0x14f   : > { %977 = vrot.lane.b32.xlu1 %v930_v6, %s1419_s25 }
 0x185   : > { %v948_v7 = vpop.permute.xlu0 %947 }
 0x186   : > { %v995_v8 = vmax.f32 %v1669_v24, %v948_v7 }
 0x188   : > { %1027 = vrot.lane.b32.xlu0 %v995_v8, %s1420_s13 }
 0x189   : > { %v950_v10 = vpop.permute.xlu0 %949 }
 0x18a   : > { %v996_v11 = vmax.f32 %v1673_v31, %v950_v10 }
 0x18c   : > { %1029 = vrot.lane.b32.xlu1 %v996_v11, %s1420_s13 }
 0x18d   : > { %v952_v12 = vpop.permute.xlu1 %951 }
 0x18e   : > { %v997_v13 = vmax.f32 %v1677_v38, %v952_v12 }
 0x190   : > { %1031 = vrot.lane.b32.xlu0 %v997_v13, %s1420_s13 }
 0x191   : > { %v954_v14 = vpop.permute.xlu1 %953 }
 0x192   : > { %v998_v15 = vmax.f32 %v1681_v45, %v954_v14 }
 0x194   : > { %1033 = vrot.lane.b32.xlu1 %v998_v15, %s1420_s13 }
 0x195   : > { %v956_v17 = vpop.permute.xlu0 %955 }
 0x196   : > { %v999_v24 = vmax.f32 %v1685_v52, %v956_v17 }
 0x198   : > { %1035 = vrot.lane.b32.xlu0 %v999_v24, %s1420_s13 }
 0x199   : > { %v958_v18 = vpop.permute.xlu1 %957 }
 0x19a   : > { %v1000_v31 = vmax.f32 %v1689_v59, %v958_v18 }
 0x19c   : > { %1037 = vrot.lane.b32.xlu1 %v1000_v31, %s1420_s13 }
 0x19d   : > { %v960_v19 = vpop.permute.xlu0 %959 }
 0x19e   : > { %v1001_v38 = vmax.f32 %v1693_v2, %v960_v19 }
 0x1a0   : > { %1039 = vrot.lane.b32.xlu0 %v1001_v38, %s1420_s13 }
 0x1a1   : > { %v962_v20 = vpop.permute.xlu1 %961 }
 0x1a2   : > { %v1002_v45 = vmax.f32 %v1697_v9, %v962_v20 }
 0x1a4   : > { %1041 = vrot.lane.b32.xlu1 %v1002_v45, %s1420_s13 }
 0x1a5   : > { %v964_v21 = vpop.permute.xlu0 %963 }
 0x1a6   : > { %v1003_v52 = vmax.f32 %v1701_v16, %v964_v21 }
 0x1a8   : > { %1043 = vrot.lane.b32.xlu0 %v1003_v52, %s1420_s13 }
 0x1a9   : > { %v966_v22 = vpop.permute.xlu1 %965 }
 0x1aa   : > { %v1004_v59 = vmax.f32 %v1705_v23, %v966_v22 }
 0x1ac   : > { %1045 = vrot.lane.b32.xlu1 %v1004_v59, %s1420_s13 }
 0x1ad   : > { %v968_v25 = vpop.permute.xlu0 %967 }
 0x1ae   : > { %v1742_v2 = vmax.f32 %v1709_v32, %v968_v25 }
 0x1b0   : > { %1047 = vrot.lane.b32.xlu0 %v1742_v2, %s1420_s13 }
 0x1b1   : > { %v970_v9 = vpop.permute.xlu1 %969 }
 0x1b2   : > { %v1747_v26 = vmax.f32 %v1713_v40, %v970_v9 }
 0x1b4   : > { %1049 = vrot.lane.b32.xlu1 %v1747_v26, %s1420_s13 }
 0x1b5   : > { %v972_v16 = vpop.permute.xlu0 %971 }
 0x1b6   : > { %v1751_v27 = vmax.f32 %v927_v48, %v972_v16 }
 0x1b8   : > { %1051 = vrot.lane.b32.xlu0 %v1751_v27, %s1420_s13 }
 0x1b9   : > { %v974_v23 = vpop.permute.xlu1 %973 }
 0x1ba   : > { %v1755_v28 = vmax.f32 %v928_v56, %v974_v23 }
 0x1bc   : > { %1053 = vrot.lane.b32.xlu1 %v1755_v28, %s1420_s13 }
 0x1bd   : > { %v976_v29 = vpop.permute.xlu0 %975 }
 0x1be   : > { %v1759_v30 = vmax.f32 %v929_v0, %v976_v29 }
 0x1c0   : > { %1055 = vrot.lane.b32.xlu0 %v1759_v30, %s1420_s13 }
 0x1c1   : > { %v978_v32 = vpop.permute.xlu1 %977 }
 0x1c2   : > { %v1763_v33 = vmax.f32 %v930_v6, %v978_v32 }
 0x1c4   : > { %1057 = vrot.lane.b32.xlu1 %v1763_v33, %s1420_s13 }
 0x1fa   : > { %v1028_v35 = vpop.permute.xlu0 %1027 }
 0x1fb   : > { %v1075_v36 = vmax.f32 %v995_v8, %v1028_v35 }
 0x1fd   : > { %v1098_v37 = vadd.f32 %v1770_v34, %v1075_v36 }
 0x1fe   : > { %v1030_v39 = vpop.permute.xlu1 %1029 }
 0x1ff   : > { %1115 = vst.msk [vmem:[%s1777_s30] sm:$0xff] %vm1114_vm0, %v1098_v37  ;;  %v1076_v40 = vmax.f32 %v996_v11, %v1030_v39 }
 0x201   : > { %v1099_v41 = vadd.f32 %v1770_v34, %v1076_v40 }
 0x202   : > { %v1032_v42 = vpop.permute.xlu0 %1031 }
 0x203   : > { %1116 = vst.msk [vmem:[%s1777_s30 + $0x8] sm:$0xff] %vm1114_vm0, %v1099_v41  ;;  %v1077_v43 = vmax.f32 %v997_v13, %v1032_v42 }
 0x205   : > { %v1100_v44 = vadd.f32 %v1770_v34, %v1077_v43 }
 0x206   : > { %v1034_v46 = vpop.permute.xlu1 %1033 }
 0x207   : > { %1117 = vst.msk [vmem:[%s1777_s30 + $0x10] sm:$0xff] %vm1114_vm0, %v1100_v44  ;;  %v1078_v47 = vmax.f32 %v998_v15, %v1034_v46 }
 0x209   : > { %v1101_v48 = vadd.f32 %v1770_v34, %v1078_v47 }
 0x20a   : > { %v1036_v49 = vpop.permute.xlu0 %1035 }
 0x20b   : > { %1118 = vst.msk [vmem:[%s1777_s30 + $0x18] sm:$0xff] %vm1114_vm0, %v1101_v48  ;;  %v1079_v50 = vmax.f32 %v999_v24, %v1036_v49 }
 0x20d   : > { %v1102_v51 = vadd.f32 %v1770_v34, %v1079_v50 }
 0x20e   : > { %v1038_v53 = vpop.permute.xlu1 %1037 }
 0x20f   : > { %1119 = vst.msk [vmem:[%s1777_s30 + $0x20] sm:$0xff] %vm1114_vm0, %v1102_v51  ;;  %v1080_v54 = vmax.f32 %v1000_v31, %v1038_v53 }
 0x211   : > { %v1103_v55 = vadd.f32 %v1770_v34, %v1080_v54 }
 0x212   : > { %v1040_v56 = vpop.permute.xlu0 %1039 }
 0x213   : > { %1120 = vst.msk [vmem:[%s1777_s30 + $0x28] sm:$0xff] %vm1114_vm0, %v1103_v55  ;;  %v1081_v57 = vmax.f32 %v1001_v38, %v1040_v56 }
 0x215   : > { %v1104_v58 = vadd.f32 %v1770_v34, %v1081_v57 }
 0x216   : > { %v1042_v60 = vpop.permute.xlu1 %1041 }
 0x217   : > { %1121 = vst.msk [vmem:[%s1777_s30 + $0x30] sm:$0xff] %vm1114_vm0, %v1104_v58  ;;  %v1082_v61 = vmax.f32 %v1002_v45, %v1042_v60 }
 0x219   : > { %v1105_v62 = vadd.f32 %v1770_v34, %v1082_v61 }
 0x21a   : > { %v1044_v63 = vpop.permute.xlu0 %1043 }
 0x21b   : > { %1122 = vst.msk [vmem:[%s1777_s30 + $0x38] sm:$0xff] %vm1114_vm0, %v1105_v62  ;;  %v1083_v0 = vmax.f32 %v1003_v52, %v1044_v63 }
 0x21d   : > { %v1106_v1 = vadd.f32 %v1770_v34, %v1083_v0 }
 0x21e   : > { %v1046_v3 = vpop.permute.xlu1 %1045 }
 0x21f   : > { %1123 = vst.msk [vmem:[%s1777_s30 + $0x40] sm:$0xff] %vm1114_vm0, %v1106_v1  ;;  %v1084_v4 = vmax.f32 %v1004_v59, %v1046_v3 }
 0x221   : > { %v1107_v5 = vadd.f32 %v1770_v34, %v1084_v4 }
 0x222   : > { %v1048_v6 = vpop.permute.xlu0 %1047 }
 0x223   : > { %1124 = vst.msk [vmem:[%s1777_s30 + $0x48] sm:$0xff] %vm1114_vm0, %v1107_v5  ;;  %v1085_v7 = vmax.f32 %v1742_v2, %v1048_v6 }
 0x225   : > { %v1108_v8 = vadd.f32 %v1770_v34, %v1085_v7 }
 0x226   : > { %v1050_v10 = vpop.permute.xlu1 %1049 }
 0x227   : > { %1125 = vst.msk [vmem:[%s1777_s30 + $0x50] sm:$0xff] %vm1114_vm0, %v1108_v8  ;;  %v1086_v11 = vmax.f32 %v1747_v26, %v1050_v10 }
 0x229   : > { %v1109_v12 = vadd.f32 %v1770_v34, %v1086_v11 }
 0x22a   : > { %v1052_v13 = vpop.permute.xlu0 %1051 }
 0x22b   : > { %1126 = vst.msk [vmem:[%s1777_s30 + $0x58] sm:$0xff] %vm1114_vm0, %v1109_v12  ;;  %v1087_v14 = vmax.f32 %v1751_v27, %v1052_v13 }
 0x22d   : > { %v1110_v15 = vadd.f32 %v1770_v34, %v1087_v14 }
 0x22e   : > { %v1054_v17 = vpop.permute.xlu1 %1053 }
 0x22f   : > { %1127 = vst.msk [vmem:[%s1777_s30 + $0x60] sm:$0xff] %vm1114_vm0, %v1110_v15  ;;  %v1088_v24 = vmax.f32 %v1755_v28, %v1054_v17 }
 0x231   : > { %v1111_v18 = vadd.f32 %v1770_v34, %v1088_v24 }
 0x232   : > { %v1056_v31 = vpop.permute.xlu0 %1055 }
 0x233   : > { %1128 = vst.msk [vmem:[%s1777_s30 + $0x68] sm:$0xff] %vm1114_vm0, %v1111_v18  ;;  %v1089_v19 = vmax.f32 %v1759_v30, %v1056_v31 }
 0x235   : > { %v1112_v38 = vadd.f32 %v1770_v34, %v1089_v19 }
 0x236   : > { %v1058_v20 = vpop.permute.xlu1 %1057 }
 0x237   : > { %1129 = vst.msk [vmem:[%s1777_s30 + $0x70] sm:$0xff] %vm1114_vm0, %v1112_v38  ;;  %v1090_v45 = vmax.f32 %v1763_v33, %v1058_v20 }
 0x239   : > { %v1113_v21 = vadd.f32 %v1770_v34, %v1090_v45 }
 0x23b   : > { %1130 = vst.msk [vmem:[%s1777_s30 + $0x78] sm:$0xff] %vm1114_vm0, %v1113_v21 }
 0x23c PF: > { %s13_s12 = sadd.s32 1, %s1417_s12  }
 0x23d   : > { %p10_p4 = scmp.ge.s32.totalorder %s13_s12, 4  }
 0x23f   :  { %12 = sbr.rel (!%p10_p4) target bundleno = 1 (0x1), region = 62 }

</bundles_post_ra>
